<compile_context>
chip_gen: v7x
topology: tpu7x:2x2x1
jax: 0.10.0
libtpu: 0.0.40
codegen_flags: <defaults>
</compile_context>

<pallas_src>
import functools

import jax
import jax.numpy as jnp
from jax.experimental import pallas as pl
from jax.experimental.pallas import tpu as pltpu


def _round_up(x, m):
    return (x + m - 1) // m * m


def mlp_kernel(ids_ref, emb_ref, w1_ref, b1_ref, w2_ref, b2_ref,
               w3_ref, b3_ref, m1_ref, m2_ref, out_ref, *, apply_dropout):
    """One batch tile: gather+mean (as counts @ table) -> 3 Linears + ReLU + dropout."""
    ids = ids_ref[...]                       # (TB, L) int32
    tb, seq_len = ids.shape
    vpad = emb_ref.shape[0]

    # counts[b, v] = #{l : ids[b, l] == v}; built with 2-D compares only.
    iota_v = jax.lax.broadcasted_iota(jnp.int32, (tb, vpad), 1)
    counts = jnp.zeros((tb, vpad), jnp.float32)
    for l in range(seq_len):                 # static, small L -> fully unrolled
        counts = counts + (iota_v == ids[:, l:l + 1]).astype(jnp.float32)
    counts = counts * (1.0 / seq_len)        # fold the mean's 1/L here (padding rows
                                             # of the table are zero, so this matches
                                             # torch.mean(dim=1) on the padded tensor)

    # Mean-pooled embedding as an MXU matmul: (TB, Vp) @ (Vp, D) -> (TB, D)
    x = jnp.dot(counts.astype(jnp.bfloat16), emb_ref[...],
                preferred_element_type=jnp.float32)

    h = jnp.dot(x.astype(jnp.bfloat16), w1_ref[...],
                preferred_element_type=jnp.float32) + b1_ref[...]
    h = jnp.maximum(h, 0.0)
    if apply_dropout:
        h = h * m1_ref[...]                  # mask already scaled by 1/(1-p)

    h = jnp.dot(h.astype(jnp.bfloat16), w2_ref[...],
                preferred_element_type=jnp.float32) + b2_ref[...]
    h = jnp.maximum(h, 0.0)
    if apply_dropout:
        h = h * m2_ref[...]

    y = jnp.dot(h.astype(jnp.bfloat16), w3_ref[...],
                preferred_element_type=jnp.float32) + b3_ref[...]
    out_ref[...] = y.astype(out_ref.dtype)


def mlp_classifier_forward(token_ids, params, *, dropout_p=0.3, training=True,
                           seed=0, tile_b=8):
    emb = params["embeddings"]               # (Vp, D) bf16, padded vocab rows = 0
    w1, b1 = params["w1"], params["b1"]
    w2, b2 = params["w2"], params["b2"]
    w3, b3 = params["w3"], params["b3"]
    n_labels = params["n_labels"]

    B, L = token_ids.shape
    Vp, D = emb.shape
    H1 = w1.shape[1]
    H2 = w2.shape[1]
    Np = w3.shape[1]                         # n_labels padded to 128 lanes

    # Pad batch up to a multiple of tile_b (padding rows use token id 0 -> padding_idx).
    Bp = _round_up(max(B, tile_b), tile_b)
    if Bp != B:
        token_ids = jnp.pad(token_ids, ((0, Bp - B), (0, 0)))

    # Dropout masks generated outside the kernel (inverted dropout, per example, so
    # batch tiling cannot reuse a mask).  Torch's RNG stream is not reproduced.
    apply_dropout = bool(training) and float(dropout_p) > 0.0
    if apply_dropout:
        k1, k2 = jax.random.split(jax.random.PRNGKey(seed))
        scale = 1.0 / (1.0 - dropout_p)
        m1 = jax.random.bernoulli(k1, 1.0 - dropout_p, (Bp, H1)).astype(jnp.float32) * scale
        m2 = jax.random.bernoulli(k2, 1.0 - dropout_p, (Bp, H2)).astype(jnp.float32) * scale
    else:
        m1 = jnp.ones((Bp, H1), jnp.float32)
        m2 = jnp.ones((Bp, H2), jnp.float32)

    grid = (Bp // tile_b,)
    const = lambda i: (0, 0)                 # weights/table: VMEM-resident, no re-DMA
    kernel = functools.partial(mlp_kernel, apply_dropout=apply_dropout)

    out = pl.pallas_call(
        kernel,
        out_shape=jax.ShapeDtypeStruct((Bp, Np), jnp.float32),
        grid=grid,
        in_specs=[
            pl.BlockSpec((tile_b, L), lambda i: (i, 0)),    # token ids
            pl.BlockSpec((Vp, D), const),                   # embedding table
            pl.BlockSpec((D, H1), const),                   # w1
            pl.BlockSpec((1, H1), const),                   # b1
            pl.BlockSpec((H1, H2), const),                  # w2
            pl.BlockSpec((1, H2), const),                   # b2
            pl.BlockSpec((H2, Np), const),                  # w3 (padded N)
            pl.BlockSpec((1, Np), const),                   # b3 (padded N)
            pl.BlockSpec((tile_b, H1), lambda i: (i, 0)),   # dropout mask 1
            pl.BlockSpec((tile_b, H2), lambda i: (i, 0)),   # dropout mask 2
        ],
        out_specs=pl.BlockSpec((tile_b, Np), lambda i: (i, 0)),
        compiler_params=pltpu.CompilerParams(
            dimension_semantics=("parallel",)),             # shard batch tiles over TCs
    )(token_ids, emb, w1, b1, w2, b2, w3, b3, m1, m2)

    return out[:B, :n_labels]


def init_params(key, vocab_size, vector_size, hidden_layers, n_labels):
    """Deterministic synthetic parameters (no checkpoint / embedding-file loading)."""
    keys = jax.random.split(key, 4)
    Vp = _round_up(vocab_size, 128)          # lane-dense counts matrix
    Np = _round_up(n_labels, 128)            # lane-dense output stores

    # Embedding matrix: randn, padding row 0 zeroed (padding_idx=0); extra vocab
    # rows are zero and never indexed.
    emb = jax.random.normal(keys[0], (vocab_size, vector_size), dtype=jnp.float32)
    emb = emb.at[0].set(0.0)
    emb = jnp.pad(emb, ((0, Vp - vocab_size), (0, 0)))

    def linear_init(k, fan_in, fan_out, pad_out=None):
        # torch.nn.Linear default init: U(-1/sqrt(fan_in), 1/sqrt(fan_in))
        kw, kb = jax.random.split(k)
        bound = 1.0 / jnp.sqrt(fan_in)
        w = jax.random.uniform(kw, (fan_in, fan_out), jnp.float32, -bound, bound)
        b = jax.random.uniform(kb, (1, fan_out), jnp.float32, -bound, bound)
        if pad_out is not None and pad_out > fan_out:
            w = jnp.pad(w, ((0, 0), (0, pad_out - fan_out)))
            b = jnp.pad(b, ((0, 0), (0, pad_out - fan_out)))
        return w, b

    w1, b1 = linear_init(keys[1], vector_size, hidden_layers[0])
    w2, b2 = linear_init(keys[2], hidden_layers[0], hidden_layers[1])
    w3, b3 = linear_init(keys[3], hidden_layers[1], n_labels, pad_out=Np)

    return {
        "embeddings": emb.astype(jnp.bfloat16),
        "w1": w1.astype(jnp.bfloat16), "b1": b1,
        "w2": w2.astype(jnp.bfloat16), "b2": b2,
        "w3": w3.astype(jnp.bfloat16), "b3": b3,
        "n_labels": n_labels,
    }


if __name__ == "__main__":
    # Small shapes consistent with the module's constructor arguments.
    VOCAB = 50
    VECTOR_SIZE = 128          # vector_size
    HIDDEN = [64, 32]          # hidden_layers
    N_LABELS = 4               # n_labels
    B, L = 16, 8               # batch of token-id sequences (2 batch tiles of 8)

    key = jax.random.PRNGKey(0)
    pkey, xkey = jax.random.split(key)
    params = init_params(pkey, VOCAB, VECTOR_SIZE, HIDDEN, N_LABELS)

    token_ids = jax.random.randint(xkey, (B, L), 0, VOCAB, dtype=jnp.int32)

    out = mlp_classifier_forward(token_ids, params, dropout_p=0.3,
                                 training=True, seed=0, tile_b=8)
    out = jax.block_until_ready(out)
    assert out.shape == (B, N_LABELS)
    assert bool(jnp.all(jnp.isfinite(out)))
    print("KERNEL_OK")
</pallas_src>

<mosaic_0001>
module attributes {stable_mosaic.version = 11 : i64} {
  func.func @mlp_kernel(%arg0: i32, %arg1: memref<8x8xi32, #tpu.memory_space<vmem>>, %arg2: memref<128x128xbf16, #tpu.memory_space<vmem>>, %arg3: memref<128x64xbf16, #tpu.memory_space<vmem>>, %arg4: memref<1x64xf32, #tpu.memory_space<vmem>>, %arg5: memref<64x32xbf16, #tpu.memory_space<vmem>>, %arg6: memref<1x32xf32, #tpu.memory_space<vmem>>, %arg7: memref<32x128xbf16, #tpu.memory_space<vmem>>, %arg8: memref<1x128xf32, #tpu.memory_space<vmem>>, %arg9: memref<8x64xf32, #tpu.memory_space<vmem>>, %arg10: memref<8x32xf32, #tpu.memory_space<vmem>>, %arg11: memref<8x128xf32, #tpu.memory_space<vmem>>) attributes {dimension_semantics = [#tpu.dimension_semantics<parallel>], iteration_bounds = array<i64: 2>, scalar_prefetch = 0 : i64, scratch_operands = 0 : i64, tpu.core_type = #tpu.core_type<tc>, window_params = [{transform_indices = @transform_0, window_bounds = array<i64: 8, 8>}, {pipeline_mode = #tpu.pipeline_mode<synchronous>, transform_indices = @transform_1, window_bounds = array<i64: 128, 128>}, {pipeline_mode = #tpu.pipeline_mode<synchronous>, transform_indices = @transform_2, window_bounds = array<i64: 128, 64>}, {pipeline_mode = #tpu.pipeline_mode<synchronous>, transform_indices = @transform_3, window_bounds = array<i64: 1, 64>}, {pipeline_mode = #tpu.pipeline_mode<synchronous>, transform_indices = @transform_4, window_bounds = array<i64: 64, 32>}, {pipeline_mode = #tpu.pipeline_mode<synchronous>, transform_indices = @transform_5, window_bounds = array<i64: 1, 32>}, {pipeline_mode = #tpu.pipeline_mode<synchronous>, transform_indices = @transform_6, window_bounds = array<i64: 32, 128>}, {pipeline_mode = #tpu.pipeline_mode<synchronous>, transform_indices = @transform_7, window_bounds = array<i64: 1, 128>}, {transform_indices = @transform_8, window_bounds = array<i64: 8, 64>}, {transform_indices = @transform_9, window_bounds = array<i64: 8, 32>}, {transform_indices = @transform_10, window_bounds = array<i64: 8, 128>}]} {
    %c0 = arith.constant 0 : index
    %c0_0 = arith.constant 0 : index
    %0 = vector.load %arg1[%c0, %c0_0] : memref<8x8xi32, #tpu.memory_space<vmem>>, vector<8x8xi32>
    %1 = tpu.iota {dimensions = array<i32: 1>} : vector<8x128xi32>
    %cst = arith.constant 0.000000e+00 : f32
    %2 = vector.broadcast %cst : f32 to vector<8x128xf32>
    %3 = vector.extract_strided_slice %0 {offsets = [0, 0], sizes = [8, 1], strides = [1, 1]} : vector<8x8xi32> to vector<8x1xi32>
    %4 = vector.broadcast %3 : vector<8x1xi32> to vector<8x128xi32>
    %5 = arith.cmpi eq, %1, %4 : vector<8x128xi32>
    %6 = arith.extui %5 : vector<8x128xi1> to vector<8x128xi32>
    %7 = arith.sitofp %6 : vector<8x128xi32> to vector<8x128xf32>
    %8 = arith.addf %2, %7 : vector<8x128xf32>
    %9 = vector.extract_strided_slice %0 {offsets = [0, 1], sizes = [8, 1], strides = [1, 1]} : vector<8x8xi32> to vector<8x1xi32>
    %10 = vector.broadcast %9 : vector<8x1xi32> to vector<8x128xi32>
    %11 = arith.cmpi eq, %1, %10 : vector<8x128xi32>
    %12 = arith.extui %11 : vector<8x128xi1> to vector<8x128xi32>
    %13 = arith.sitofp %12 : vector<8x128xi32> to vector<8x128xf32>
    %14 = arith.addf %8, %13 : vector<8x128xf32>
    %15 = vector.extract_strided_slice %0 {offsets = [0, 2], sizes = [8, 1], strides = [1, 1]} : vector<8x8xi32> to vector<8x1xi32>
    %16 = vector.broadcast %15 : vector<8x1xi32> to vector<8x128xi32>
    %17 = arith.cmpi eq, %1, %16 : vector<8x128xi32>
    %18 = arith.extui %17 : vector<8x128xi1> to vector<8x128xi32>
    %19 = arith.sitofp %18 : vector<8x128xi32> to vector<8x128xf32>
    %20 = arith.addf %14, %19 : vector<8x128xf32>
    %21 = vector.extract_strided_slice %0 {offsets = [0, 3], sizes = [8, 1], strides = [1, 1]} : vector<8x8xi32> to vector<8x1xi32>
    %22 = vector.broadcast %21 : vector<8x1xi32> to vector<8x128xi32>
    %23 = arith.cmpi eq, %1, %22 : vector<8x128xi32>
    %24 = arith.extui %23 : vector<8x128xi1> to vector<8x128xi32>
    %25 = arith.sitofp %24 : vector<8x128xi32> to vector<8x128xf32>
    %26 = arith.addf %20, %25 : vector<8x128xf32>
    %27 = vector.extract_strided_slice %0 {offsets = [0, 4], sizes = [8, 1], strides = [1, 1]} : vector<8x8xi32> to vector<8x1xi32>
    %28 = vector.broadcast %27 : vector<8x1xi32> to vector<8x128xi32>
    %29 = arith.cmpi eq, %1, %28 : vector<8x128xi32>
    %30 = arith.extui %29 : vector<8x128xi1> to vector<8x128xi32>
    %31 = arith.sitofp %30 : vector<8x128xi32> to vector<8x128xf32>
    %32 = arith.addf %26, %31 : vector<8x128xf32>
    %33 = vector.extract_strided_slice %0 {offsets = [0, 5], sizes = [8, 1], strides = [1, 1]} : vector<8x8xi32> to vector<8x1xi32>
    %34 = vector.broadcast %33 : vector<8x1xi32> to vector<8x128xi32>
    %35 = arith.cmpi eq, %1, %34 : vector<8x128xi32>
    %36 = arith.extui %35 : vector<8x128xi1> to vector<8x128xi32>
    %37 = arith.sitofp %36 : vector<8x128xi32> to vector<8x128xf32>
    %38 = arith.addf %32, %37 : vector<8x128xf32>
    %39 = vector.extract_strided_slice %0 {offsets = [0, 6], sizes = [8, 1], strides = [1, 1]} : vector<8x8xi32> to vector<8x1xi32>
    %40 = vector.broadcast %39 : vector<8x1xi32> to vector<8x128xi32>
    %41 = arith.cmpi eq, %1, %40 : vector<8x128xi32>
    %42 = arith.extui %41 : vector<8x128xi1> to vector<8x128xi32>
    %43 = arith.sitofp %42 : vector<8x128xi32> to vector<8x128xf32>
    %44 = arith.addf %38, %43 : vector<8x128xf32>
    %45 = vector.extract_strided_slice %0 {offsets = [0, 7], sizes = [8, 1], strides = [1, 1]} : vector<8x8xi32> to vector<8x1xi32>
    %46 = vector.broadcast %45 : vector<8x1xi32> to vector<8x128xi32>
    %47 = arith.cmpi eq, %1, %46 : vector<8x128xi32>
    %48 = arith.extui %47 : vector<8x128xi1> to vector<8x128xi32>
    %49 = arith.sitofp %48 : vector<8x128xi32> to vector<8x128xf32>
    %50 = arith.addf %44, %49 : vector<8x128xf32>
    %cst_1 = arith.constant 1.250000e-01 : f32
    %51 = vector.broadcast %cst_1 : f32 to vector<8x128xf32>
    %52 = arith.mulf %50, %51 : vector<8x128xf32>
    %53 = arith.truncf %52 : vector<8x128xf32> to vector<8x128xbf16>
    %c0_2 = arith.constant 0 : index
    %c0_3 = arith.constant 0 : index
    %54 = vector.load %arg2[%c0_2, %c0_3] : memref<128x128xbf16, #tpu.memory_space<vmem>>, vector<128x128xbf16>
    %cst_4 = arith.constant dense<0.000000e+00> : vector<8x128xf32>
    %55 = tpu.matmul %53, %54, %cst_4 {dimension_numbers = #tpu.dot_dimension_numbers<[1], [0], [0], [1], [0, 0, 1, 1], [], []>} : vector<8x128xbf16>, vector<128x128xbf16>, vector<8x128xf32> -> vector<8x128xf32>
    %56 = arith.truncf %55 : vector<8x128xf32> to vector<8x128xbf16>
    %c0_5 = arith.constant 0 : index
    %c0_6 = arith.constant 0 : index
    %57 = vector.load %arg3[%c0_5, %c0_6] : memref<128x64xbf16, #tpu.memory_space<vmem>>, vector<128x64xbf16>
    %cst_7 = arith.constant dense<0.000000e+00> : vector<8x64xf32>
    %58 = tpu.matmul %56, %57, %cst_7 {dimension_numbers = #tpu.dot_dimension_numbers<[1], [0], [0], [1], [0, 0, 1, 1], [], []>} : vector<8x128xbf16>, vector<128x64xbf16>, vector<8x64xf32> -> vector<8x64xf32>
    %c0_8 = arith.constant 0 : index
    %c0_9 = arith.constant 0 : index
    %59 = vector.load %arg4[%c0_8, %c0_9] : memref<1x64xf32, #tpu.memory_space<vmem>>, vector<1x64xf32>
    %60 = vector.broadcast %59 : vector<1x64xf32> to vector<8x64xf32>
    %61 = arith.addf %58, %60 : vector<8x64xf32>
    %cst_10 = arith.constant 0.000000e+00 : f32
    %62 = vector.broadcast %cst_10 : f32 to vector<8x64xf32>
    %63 = arith.maximumf %61, %62 : vector<8x64xf32>
    %c0_11 = arith.constant 0 : index
    %c0_12 = arith.constant 0 : index
    %64 = vector.load %arg9[%c0_11, %c0_12] : memref<8x64xf32, #tpu.memory_space<vmem>>, vector<8x64xf32>
    %65 = arith.mulf %63, %64 : vector<8x64xf32>
    %66 = arith.truncf %65 : vector<8x64xf32> to vector<8x64xbf16>
    %c0_13 = arith.constant 0 : index
    %c0_14 = arith.constant 0 : index
    %67 = vector.load %arg5[%c0_13, %c0_14] : memref<64x32xbf16, #tpu.memory_space<vmem>>, vector<64x32xbf16>
    %cst_15 = arith.constant dense<0.000000e+00> : vector<8x32xf32>
    %68 = tpu.matmul %66, %67, %cst_15 {dimension_numbers = #tpu.dot_dimension_numbers<[1], [0], [0], [1], [0, 0, 1, 1], [], []>} : vector<8x64xbf16>, vector<64x32xbf16>, vector<8x32xf32> -> vector<8x32xf32>
    %c0_16 = arith.constant 0 : index
    %c0_17 = arith.constant 0 : index
    %69 = vector.load %arg6[%c0_16, %c0_17] : memref<1x32xf32, #tpu.memory_space<vmem>>, vector<1x32xf32>
    %70 = vector.broadcast %69 : vector<1x32xf32> to vector<8x32xf32>
    %71 = arith.addf %68, %70 : vector<8x32xf32>
    %cst_18 = arith.constant 0.000000e+00 : f32
    %72 = vector.broadcast %cst_18 : f32 to vector<8x32xf32>
    %73 = arith.maximumf %71, %72 : vector<8x32xf32>
    %c0_19 = arith.constant 0 : index
    %c0_20 = arith.constant 0 : index
    %74 = vector.load %arg10[%c0_19, %c0_20] : memref<8x32xf32, #tpu.memory_space<vmem>>, vector<8x32xf32>
    %75 = arith.mulf %73, %74 : vector<8x32xf32>
    %76 = arith.truncf %75 : vector<8x32xf32> to vector<8x32xbf16>
    %c0_21 = arith.constant 0 : index
    %c0_22 = arith.constant 0 : index
    %77 = vector.load %arg7[%c0_21, %c0_22] : memref<32x128xbf16, #tpu.memory_space<vmem>>, vector<32x128xbf16>
    %cst_23 = arith.constant dense<0.000000e+00> : vector<8x128xf32>
    %78 = tpu.matmul %76, %77, %cst_23 {dimension_numbers = #tpu.dot_dimension_numbers<[1], [0], [0], [1], [0, 0, 1, 1], [], []>} : vector<8x32xbf16>, vector<32x128xbf16>, vector<8x128xf32> -> vector<8x128xf32>
    %c0_24 = arith.constant 0 : index
    %c0_25 = arith.constant 0 : index
    %79 = vector.load %arg8[%c0_24, %c0_25] : memref<1x128xf32, #tpu.memory_space<vmem>>, vector<1x128xf32>
    %80 = vector.broadcast %79 : vector<1x128xf32> to vector<8x128xf32>
    %81 = arith.addf %78, %80 : vector<8x128xf32>
    %c0_26 = arith.constant 0 : index
    %c0_27 = arith.constant 0 : index
    %82 = vector.load %arg11[%c0_26, %c0_27] : memref<8x128xf32, #tpu.memory_space<vmem>>, vector<8x128xf32>
    tpu.vector_store %arg11[%c0_26, %c0_27], %81 {strides = array<i32>} : memref<8x128xf32, #tpu.memory_space<vmem>>, vector<8x128xf32>,
    return
  }
  func.func @transform_0(%arg0: i32) -> (i32, i32) {
    %c0_i32 = arith.constant 0 : i32
    %c0_i32_0 = arith.constant 0 : i32
    return %arg0, %c0_i32 : i32, i32
  }
  func.func @transform_1(%arg0: i32) -> (i32, i32) {
    %c0_i32 = arith.constant 0 : i32
    %c0_i32_0 = arith.constant 0 : i32
    %c0_i32_1 = arith.constant 0 : i32
    return %c0_i32, %c0_i32_0 : i32, i32
  }
  func.func @transform_2(%arg0: i32) -> (i32, i32) {
    %c0_i32 = arith.constant 0 : i32
    %c0_i32_0 = arith.constant 0 : i32
    %c0_i32_1 = arith.constant 0 : i32
    return %c0_i32, %c0_i32_0 : i32, i32
  }
  func.func @transform_3(%arg0: i32) -> (i32, i32) {
    %c0_i32 = arith.constant 0 : i32
    %c0_i32_0 = arith.constant 0 : i32
    %c0_i32_1 = arith.constant 0 : i32
    return %c0_i32, %c0_i32_0 : i32, i32
  }
  func.func @transform_4(%arg0: i32) -> (i32, i32) {
    %c0_i32 = arith.constant 0 : i32
    %c0_i32_0 = arith.constant 0 : i32
    %c0_i32_1 = arith.constant 0 : i32
    return %c0_i32, %c0_i32_0 : i32, i32
  }
  func.func @transform_5(%arg0: i32) -> (i32, i32) {
    %c0_i32 = arith.constant 0 : i32
    %c0_i32_0 = arith.constant 0 : i32
    %c0_i32_1 = arith.constant 0 : i32
    return %c0_i32, %c0_i32_0 : i32, i32
  }
  func.func @transform_6(%arg0: i32) -> (i32, i32) {
    %c0_i32 = arith.constant 0 : i32
    %c0_i32_0 = arith.constant 0 : i32
    %c0_i32_1 = arith.constant 0 : i32
    return %c0_i32, %c0_i32_0 : i32, i32
  }
  func.func @transform_7(%arg0: i32) -> (i32, i32) {
    %c0_i32 = arith.constant 0 : i32
    %c0_i32_0 = arith.constant 0 : i32
    %c0_i32_1 = arith.constant 0 : i32
    return %c0_i32, %c0_i32_0 : i32, i32
  }
  func.func @transform_8(%arg0: i32) -> (i32, i32) {
    %c0_i32 = arith.constant 0 : i32
    %c0_i32_0 = arith.constant 0 : i32
    return %arg0, %c0_i32 : i32, i32
  }
  func.func @transform_9(%arg0: i32) -> (i32, i32) {
    %c0_i32 = arith.constant 0 : i32
    %c0_i32_0 = arith.constant 0 : i32
    return %arg0, %c0_i32 : i32, i32
  }
  func.func @transform_10(%arg0: i32) -> (i32, i32) {
    %c0_i32 = arith.constant 0 : i32
    %c0_i32_0 = arith.constant 0 : i32
    return %arg0, %c0_i32 : i32, i32
  }
}

</mosaic_0001>

<bundles_post_ra>
// kernel: tpu_custom_call.1
= control target key start
LH: loop header
LB: loop body
LE: loop exit
PB: predicated region body
PF: predicated region fallthrough
CT: control target
= control target key end

     0   :  { %15 = vsyncpa [#allocation3], 0  ;;  %s1490_s0 = inlined_call_operand.vmem [shape: s32[16,8], index: 0, kind: input, shape index: {}]   ;;  %s1491_s1 = inlined_call_operand.vmem [shape: bf16[128,128], index: 1, kind: input, shape index: {}]   ;;  %s1492_s2 = inlined_call_operand.vmem [shape: bf16[128,64], index: 2, kind: input, shape index: {}]   ;;  %s1493_s3 = inlined_call_operand.vmem [shape: f32[1,64], index: 3, kind: input, shape index: {}]   ;;  %s1494_s4 = inlined_call_operand.vmem [shape: bf16[64,32], index: 4, kind: input, shape index: {}]   ;;  %s1495_s5 = inlined_call_operand.vmem [shape: f32[1,32], index: 5, kind: input, shape index: {}]   ;;  %s1496_s6 = inlined_call_operand.vmem [shape: bf16[32,128], index: 6, kind: input, shape index: {}]   ;;  %s1497_s7 = inlined_call_operand.vmem [shape: f32[1,128], index: 7, kind: input, shape index: {}]   ;;  %s1498_s8 = inlined_call_operand.vmem [shape: f32[16,64], index: 8, kind: input, shape index: {}]   ;;  %s1499_s9 = inlined_call_operand.vmem [shape: f32[16,32], index: 9, kind: input, shape index: {}]   ;;  %s1500_s10 = inlined_call_operand.hbm [shape: f32[16,128], index: 10, kind: output, shape index: {}]  }
   0x1   :  { %17 = vsyncpa [#allocation3 + $0x1], 0  ;;  %s1266_s13 = smov 0   ;;  %s1268_s14 = smov 0  }
   0x2   :  { %s1270_s15 = smov 0   ;;  %s1272_s16 = smov 0  }
   0x3 LB: > { %s1287_s17 = sadd.s32 4294967295, %s1198_s16   ;;  %s923_s18 = sadd.s32 4294967294, %s1198_s16   ;;  %s1198_s16 = sphi %s1272_s16, %s1506_s16   ;;  %s1194_s15 = sphi %s1270_s15, %s1505_s15   ;;  %s1190_s14 = sphi %s1268_s14, %s1504_s14   ;;  %s1186_s13 = sphi %s1266_s13, %s1503_s13  }
   0x4   : > { %s1291_s19 = sadd.s32 1, %s1198_s16   ;;  %s255_s20 = sadd.s32 1, %s1194_s15 }
   0x5   : > { %s252_s21 = ssub.s32 %s1198_s16, %s1291_s19  ;;  %p265_p0 = scmp.ne.s32.totalorder %s1194_s15, %s1190_s14 }
   0x6   : > { %p253_p1 = scmp.eq.s32.totalorder %s252_s21, 0  ;;  %p266_p2 = scmp.eq.s32.totalorder %s1287_s17, 1 }
   0x7   : > { %p271_p3 = scmp.ne.s32.totalorder %s1190_s14, %s1186_s13  ;;  %p272_p4 = scmp.eq.s32.totalorder %s923_s18, 1 }
   0x8   : > { %s1302_s22 = scalar_select %p253_p1, %s1194_s15, %s255_s20  }
   0x9   : > { %p1304_p5 = por %p266_p2, %p265_p0  ;;  %p1308_p6 = por %p272_p4, %p271_p3 }
   0xa   : > { %p926_p7 = scmp.ge.s32.totalorder %s1198_s16, 1  ;;  %p332_p8 = scmp.lt.s32.totalorder %s1198_s16, 3 }
   0xc   : > { %p333_p9 = pnand %p926_p7, %p332_p8 }
   0xd   : > { %p377_p10 = scmp.lt.s32.totalorder (!%p333_p9), %s1287_s17, 1  ;;  %v1114_v0 = vld [vmem:[%s1491_s1] sm:$0xff] (!%p333_p9)   ;;  %v1200_v1 = vmov (!%p333_p9), 2   ;;  %v1201_v2 = vmov (!%p333_p9), 0   ;;  %v1202_v3 = vmov (!%p333_p9), 0.0   ;;  %v1115_v5 = vld [vmem:[%s1491_s1 + $0x8] sm:$0xff] (!%p333_p9)   ;;  %v391_v25 = vlaneseq (!%p333_p9) }
   0xe   : > { %336 = sbr.rel (%p333_p9) target bundleno = 1064 (0x428), region = 60  ;;  %1107 = vset.pattern.permute.xlu1 (!%p333_p9), %v1200_v1  ;;  %1105 = vset.pattern.permute.xlu0 (!%p333_p9), %v1201_v2  ;;  %v1116_v6 = vld [vmem:[%s1491_s1 + $0x10] sm:$0xff] (!%p333_p9)   ;;  %v1203_v7 = vmov (!%p333_p9), 3   ;;  %v1204_v8 = vmov (!%p333_p9), 1   ;;  %v1117_v9 = vld [vmem:[%s1491_s1 + $0x18] sm:$0xff] (!%p333_p9)   ;;  %v1205_v10 = vmov (!%p333_p9), 4  }
   0xf   : > { %996 = vmatprep.subr.bf16.mxu0 (!%p333_p9), %v1202_v3  ;;  %1016 = vmatprep.subr.bf16.mxu1 (!%p333_p9), %v1202_v3  ;;  %v1206_v11 = vmov (!%p333_p9), 5   ;;  %v1118_v12 = vld [vmem:[%s1491_s1 + $0x20] sm:$0xff] (!%p333_p9)   ;;  %v1207_v13 = vmov (!%p333_p9), 6   ;;  %v1208_v14 = vmov (!%p333_p9), 7   ;;  %v1119_v15 = vld [vmem:[%s1491_s1 + $0x28] sm:$0xff] (!%p333_p9)   ;;  %v1120_v16 = vld [vmem:[%s1491_s1 + $0x30] sm:$0xff] (!%p333_p9)  }
  0x10   : > { %997 = vmatpush3.bf16.msra.mxu0 (!%p333_p9), %v1114_v0  ;;  %v1121_v17 = vld [vmem:[%s1491_s1 + $0x38] sm:$0xff] (!%p333_p9)   ;;  %vm1209_vm0 = vmmov (!%p333_p9), 0   ;;  %v1122_v18 = vld [vmem:[%s1492_s2] sm:$0xff] (!%p333_p9)   ;;  %v1123_v19 = vld [vmem:[%s1492_s2 + $0x8] sm:$0xff] (!%p333_p9)   ;;  %v392_v28 = vand.u32 (!%p333_p9), 127, %v391_v25  ;;  %vm710_vm9 = vcmask (!%p333_p9), 523264  }
  0x11   : > { %998 = vmatprep.subr.bf16.mxu0 (!%p333_p9), %v1202_v3  ;;  %1012 = vmatprep.mubr.msk.bf16.mxu0 (!%p333_p9), %vm1209_vm0, %v1202_v3  ;;  %v1124_v20 = vld [vmem:[%s1492_s2 + $0x10] sm:$0xff] (!%p333_p9)   ;;  %v1125_v21 = vld [vmem:[%s1492_s2 + $0x18] sm:$0xff] (!%p333_p9)   ;;  %v1126_v22 = vld [vmem:[%s1492_s2 + $0x20] sm:$0xff] (!%p333_p9)   ;;  %vm781_vm10 = vcmask (!%p333_p9), 261120  }
  0x12   : > { %1032 = vmatprep.mubr.msk.bf16.mxu1 (!%p333_p9), %vm1209_vm0, %v1202_v3  ;;  %1017 = vmatpush3.bf16.msra.mxu1 (!%p333_p9), %v1122_v18  ;;  %v1127_v23 = vld [vmem:[%s1492_s2 + $0x28] sm:$0xff] (!%p333_p9)   ;;  %v1128_v24 = vld [vmem:[%s1492_s2 + $0x30] sm:$0xff] (!%p333_p9)   ;;  %v1129_v52 = vld [vmem:[%s1492_s2 + $0x38] sm:$0xff] (!%p333_p9)  }
  0x13   : > { %1018 = vmatprep.subr.bf16.mxu1 (!%p333_p9), %v1202_v3  ;;  %v1130_v53 = vld [vmem:[%s1494_s4] sm:$0xff] (!%p333_p9)   ;;  %v1131_v54 = vld [vmem:[%s1494_s4 + $0x8] sm:$0xff] (!%p333_p9)   ;;  %v1132_v60 = vld [vmem:[%s1494_s4 + $0x10] sm:$0xff] (!%p333_p9)  }
  0x14   : > { %999 = vmatpush3.bf16.msra.mxu0 (!%p333_p9), %v1115_v5  ;;  %v1133_v61 = vld [vmem:[%s1494_s4 + $0x18] sm:$0xff] (!%p333_p9)   ;;  %v947_v62 = vld [vmem:[%s1493_s3] ss:$0 sm:$0xff] (!%p333_p9) }
  0x15   : > { %s378_s27 = scalar_select %p377_p10, %s1287_s17, 1  ;;  %1000 = vmatprep.subr.bf16.mxu0 %v1202_v3 }
  0x16   : > { %1019 = vmatpush3.bf16.msra.mxu1 %v1123_v19 }
  0x17   : > { %s1321_s28 = sshll.u32 %s378_s27, 3  ;;  %1020 = vmatprep.subr.bf16.mxu1 %v1202_v3  ;;  %s967_s27 = sshll.u32 %s1287_s17, 7 }
  0x18   : > { %s380_s11 = scalar_lea.vmem %s1490_s0, %s1321_s28  ;;  %1001 = vmatpush3.bf16.msra.mxu0 %v1116_v6  ;;  %s384_s20 = scalar_lea.vmem %s1498_s8, %s1321_s28 }
  0x19   : > { %v390_v4 = vld [vmem:[%s380_s11] sm:$0xff]  ;;  %1002 = vmatprep.subr.bf16.mxu0 %v1202_v3  ;;  %s388_s18 = scalar_lea.vmem %s1499_s9, %s1321_s28  ;;  %s1448_s12 = scalar_lea.hbm %s1500_s10, %s967_s27 }
  0x1a   : > { %408 = vperm.xlu1 %1107, %v390_v4   ;;  %394 = vperm.xlu0 %1105, %v390_v4   ;;  %v668_v2 = vld [vmem:[%s384_s20] sm:$0xff]  ;;  %s374_s20 = sand.u32 1, %s1190_s14  }
  0x1b   : > { %1021 = vmatpush3.bf16.msra.mxu1 %v1124_v20  ;;  %s927_s21 = sshll.u32 %s374_s20, 3  ;;  %v962_v20 = vld [vmem:[%s1497_s7] ss:$0 sm:$0xff] }
  0x1c   : > { %1003 = vmatpush3.bf16.msra.mxu0 %v1117_v9  ;;  %1022 = vmatprep.subr.bf16.mxu1 %v1202_v3  ;;  %v1134_v9 = vld [vmem:[%s1496_s6] sm:$0xff]   ;;  %s376_s28 = scalar_lea.vmem [#allocation2], %s927_s21  ;;  %s1210_s21 = smov [#allocation2]  }
  0x1d   : > { %1004 = vmatprep.subr.bf16.mxu0 %v1202_v3  ;;  %s840_s29 = sshll.u32 %s376_s28, 4  ;;  %s1140_s25 = sshll.u32 %s1210_s21, 4  ;;  %s1450_s29 = int_to_ptr.vmem [resolvable:$true] %s840_s29  ;;  %s1141_s25 = int_to_ptr.vmem [resolvable:$false] %s1140_s25 }
  0x1e   : > { %1108 = vset.pattern.permute.xlu1 %v1203_v7  ;;  %1106 = vset.pattern.permute.xlu0 %v1204_v8  ;;  %s1136_s17 = scalar_lea.vmem %s1450_s29, 128  ;;  %s1142_s26 = scalar_lea.vmem %s1141_s25, 256 }
  0x1f   : > { %415 = vperm.xlu1 %1108, %v390_v4   ;;  %401 = vperm.xlu0 %1106, %v390_v4   ;;  %p1137_p11 = scmp.ne.s32.totalorder %s1450_s29, %s1136_s17  ;;  %p1143_p0 = scmp.lt.s32.totalorder %s1450_s29, %s1141_s25 }
  0x20   : > { %1005 = vmatpush3.bf16.msra.mxu0 %v1118_v12  ;;  %1023 = vmatpush3.bf16.msra.mxu1 %v1125_v21  ;;  %p1144_p1 = scmp.lt.s32.totalorder %s1142_s26, %s1136_s17 }
  0x21   : > { %1006 = vmatprep.subr.bf16.mxu0 %v1202_v3  ;;  %1024 = vmatprep.subr.bf16.mxu1 %v1202_v3  ;;  %p1138_p12 = pnand %p1137_p11, %p1304_p5 }
  0x22   : > { %p1145_p2 = por %p1144_p1, %p1143_p0 }
  0x23   : > { %1109 = vset.pattern.permute.xlu1 %v1205_v10  ;;  %1110 = vset.pattern.permute.xlu0 %v1206_v11  ;;  %v1135_v10 = vld [vmem:[%s1496_s6 + $0x8] sm:$0xff]   ;;  %v956_v11 = vld [vmem:[%s1495_s5] ss:$0 sm:$0xff]  ;;  %p1139_p13 = pneg %p1138_p12 }
  0x24   : > { %422 = vperm.xlu1 %1109, %v390_v4   ;;  %429 = vperm.xlu0 %1110, %v390_v4  }
  0x25   : > { %1007 = vmatpush3.bf16.msra.mxu0 %v1119_v15  ;;  %1025 = vmatpush3.bf16.msra.mxu1 %v1126_v22  ;;  %v755_v15 = vld [vmem:[%s388_s18] sm:$0xff]  ;;  %s827_s18 = scalar_lea.sflag [#allocation3], %s374_s20  ;;  %p1146_p3 = pnand %p1145_p2, %p1139_p13 }
  0x26   : > { %1008 = vmatprep.subr.bf16.mxu0 %v1202_v3  ;;  %1026 = vmatprep.subr.bf16.mxu1 %v1202_v3 }
  0x28   : > { %1111 = vset.pattern.permute.xlu1 %v1207_v13  ;;  %1113 = vset.pattern.permute.xlu0 %v1208_v14 }
  0x29   : > { %436 = vperm.xlu1 %1111, %v390_v4   ;;  %1009 = vmatpush3.bf16.msra.mxu0 %v1120_v16 }
  0x2a   : > { %1010 = vmatprep.subr.bf16.mxu0 %v1202_v3  ;;  %1027 = vmatpush3.bf16.msra.mxu1 %v1127_v23 }
  0x2b   : > { %1028 = vmatprep.subr.bf16.mxu1 %v1202_v3 }
  0x2d   : > { %1112 = vset.pattern.permute.xlu1 %v1208_v14  ;;  %1011 = vmatpush3.bf16.msra.mxu0 %v1121_v17 }
  0x2e   : > { %443 = vperm.xlu1 %1112, %v390_v4   ;;  %1036 = vmatprep.subr.bf16.mxu0 %v1202_v3 }
  0x2f   : > { %1029 = vmatpush3.bf16.msra.mxu1 %v1128_v24 }
  0x30   : > { %1030 = vmatprep.subr.bf16.mxu1 %v1202_v3 }
  0x33   : > { %1031 = vmatpush3.bf16.msra.mxu1 %v1129_v52 }
  0x34   : > { %1048 = vmatprep.subr.bf16.mxu1 %v1202_v3 }
  0x99   : > { %v409_v26 = vpop.permute.xlu1 %408  ;;  %v395_v27 = vpop.permute.xlu0 %394 }
  0x9a   : > { %vm396_vm1 = vcmp.eq.s32.totalorder %v392_v28, %v395_v27  ;;  %vm410_vm2 = vcmp.eq.s32.totalorder %v392_v28, %v409_v26 }
  0x9b   : > { %v931_v31 = vsel %vm396_vm1, 1.0, %v1202_v3  ;;  %v933_v34 = vsel %vm410_vm2, 1.0, %v1202_v3 }
  0x9e   : > { %v416_v29 = vpop.permute.xlu1 %415  ;;  %v402_v30 = vpop.permute.xlu0 %401 }
  0x9f   : > { %vm403_vm3 = vcmp.eq.s32.totalorder %v392_v28, %v402_v30  ;;  %vm417_vm4 = vcmp.eq.s32.totalorder %v392_v28, %v416_v29 }
  0xa0   : > { %v932_v32 = vsel %vm403_vm3, 1.0, %v1202_v3  ;;  %v934_v38 = vsel %vm417_vm4, 1.0, %v1202_v3 }
  0xa1   : > { %v406_v33 = vadd.f32 %v932_v32, %v931_v31 }
  0xa3   : > { %v413_v35 = vadd.f32 %v933_v34, %v406_v33  ;;  %v423_v36 = vpop.permute.xlu1 %422  ;;  %v430_v37 = vpop.permute.xlu0 %429 }
  0xa4   : > { %vm424_vm5 = vcmp.eq.s32.totalorder %v392_v28, %v423_v36  ;;  %vm431_vm6 = vcmp.eq.s32.totalorder %v392_v28, %v430_v37 }
  0xa5   : > { %v420_v39 = vadd.f32 %v934_v38, %v413_v35  ;;  %v935_v40 = vsel %vm424_vm5, 1.0, %v1202_v3  ;;  %v936_v42 = vsel %vm431_vm6, 1.0, %v1202_v3 }
  0xa7   : > { %v427_v41 = vadd.f32 %v935_v40, %v420_v39 }
  0xa8   : > { %v437_v43 = vpop.permute.xlu1 %436 }
  0xa9   : > { %vm438_vm7 = vcmp.eq.s32.totalorder %v392_v28, %v437_v43  ;;  %v434_v44 = vadd.f32 %v936_v42, %v427_v41 }
  0xaa   : > { %v937_v45 = vsel %vm438_vm7, 1.0, %v1202_v3 }
  0xab   : > { %v441_v47 = vadd.f32 %v937_v45, %v434_v44 }
  0xad   : > { %v444_v46 = vpop.permute.xlu1 %443 }
  0xae   : > { %vm445_vm8 = vcmp.eq.s32.totalorder %v392_v28, %v444_v46 }
  0xaf   : > { %v938_v48 = vsel %vm445_vm8, 1.0, %v1202_v3 }
  0xb0   : > { %v448_v49 = vadd.f32 %v938_v48, %v441_v47 }
  0xb2   : > { %v449_v50 = vmul.f32 0.125, %v448_v49 }
  0xb4   : > { %v450_v51 = vpack.c.bf16 %v449_v50, %v449_v50 }
  0xb6   : > { %1013 = vmatmul.mubr.bf16.vlgmr.msra.gmra.mrb[0].mxu0 %v450_v51 }
  0xb7   : > { %1044 = vmatprep.mubr.msk.bf16.mxu0 %vm1209_vm0, %v1202_v3  ;;  %1037 = vmatpush3.bf16.msra.mxu0 %v1130_v53 }
  0xb8   : > { %1038 = vmatprep.subr.bf16.mxu0 %v1202_v3 }
  0xbb   : > { %1039 = vmatpush3.bf16.msra.mxu0 %v1131_v54 }
  0xbc   : > { %1040 = vmatprep.subr.bf16.mxu0 %v1202_v3 }
  0xbf   : > { %1041 = vmatpush3.bf16.msra.mxu0 %v1132_v60 }
  0xc0   : > { %1042 = vmatprep.subr.bf16.mxu0 %v1202_v3 }
  0xc3   : > { %1043 = vmatpush3.bf16.msra.mxu0 %v1133_v61 }
 0x189   : > { %v549_v55 = vpop.f32.mrb[0].mxu0 }
 0x18a   : > { %v555_v56 = vpack.c.bf16 %v549_v55, %v549_v55  ;;  %v1014_v57 = vpop.f32.mrb[1].mxu0 }
 0x18b   : > { %v552_v58 = vpop.f32.mrb[2].mxu0 }
 0x18c   : > { %v1015_v59 = vpop.f32.mrb[3].mxu0  ;;  %1033 = vmatmul.mubr.bf16.vlgmr.msra.gmra.mrb[0].mxu1 %v555_v56 }
 0x18d   : > { %1052 = vmatprep.mubr.msk.bf16.mxu1 %vm1209_vm0, %v1202_v3  ;;  %1049 = vmatpush3.bf16.msra.mxu1 %v1134_v9 }
 0x18e   : > { %1050 = vmatprep.subr.bf16.mxu1 %v1202_v3 }
 0x191   : > { %1051 = vmatpush3.bf16.msra.mxu1 %v1135_v10 }
 0x25f   : > { %v661_v63 = vpop.f32.mrb[0].mxu1 }
 0x260   : > { %v662_v0 = vadd.f32 %v947_v62, %v661_v63  ;;  %v1034_v1 = vpop.f32.mrb[1].mxu1 }
 0x261   : > { %v664_v4 = vpop.f32.mrb[2].mxu1 }
 0x262   : > { %v667_v5 = vmax.f32 %v662_v0, 0.0  ;;  %v1035_v6 = vpop.f32.mrb[3].mxu1 }
 0x264   : > { %v669_v7 = vmul.f32 %v668_v2, %v667_v5 }
 0x266   : > { %v670_v8 = vpack.c.bf16 %v669_v7, %v669_v7 }
 0x268   : > { %1045 = vmatmul.mubr.msk.bf16.vlgmr.msra.gmra.mrb[4].mxu0 %vm710_vm9, %v670_v8 }
 0x33b   : > { %v748_v12 = vpop.f32.mrb[4].mxu0 }
 0x33c   : > { %v749_v13 = vadd.f32 %v956_v11, %v748_v12  ;;  %v1046_v14 = vpop.f32.mrb[5].mxu0 }
 0x33d   : > { %v751_v3 = vpop.f32.mrb[6].mxu0 }
 0x33e   : > { %v754_v16 = vmax.f32 %v749_v13, 0.0  ;;  %v1047_v17 = vpop.f32.mrb[7].mxu0 }
 0x340   : > { %v756_v18 = vmul.f32 %v755_v15, %v754_v16 }
 0x342   : > { %v757_v19 = vpack.c.bf16 %v756_v18, %v756_v18 }
 0x344   : > { %1053 = vmatmul.mubr.msk.bf16.vlgmr.msra.gmra.mrb[4].mxu1 %vm781_vm10, %v757_v19 }
 0x417   : > { %v819_v21 = vpop.f32.mrb[4].mxu1 }
 0x418   : > { %v820_v22 = vadd.f32 %v962_v20, %v819_v21  ;;  %v1054_v23 = vpop.f32.mrb[5].mxu1 }
 0x419   : > { %v822_v24 = vpop.f32.mrb[6].mxu1 }
 0x41a   : > { %825 = vst [vmem:[%s376_s28] sm:$0xff] %v820_v22  ;;  %v1055_v25 = vpop.f32.mrb[7].mxu1 }
 0x41b   : > { %1149 = shalt.err (!%p1146_p3)
}
 0x41c   : > { %s1150_s20 = scalar_lea.hbm %s1448_s12, 128  ;;  %s1154_s30 = scalar_lea.hbm %s1500_s10, 256 }
 0x41d   : > { %p1151_p4 = scmp.ne.s32.totalorder %s1448_s12, %s1150_s20  ;;  %p1155_p9 = scmp.lt.u32.totalorder %s1448_s12, %s1500_s10 }
 0x41e   : > { %p1156_p10 = scmp.lt.u32.totalorder %s1154_s30, %s1150_s20  ;;  %p1158_p12 = scmp.lt.u32.totalorder %s1150_s20, %s1448_s12 }
 0x41f   : > { %p1152_p7 = pnand %p1151_p4, %p1304_p5 }
 0x420   : > { %p1157_p11 = por %p1156_p10, %p1155_p9 }
 0x421   : > { %p1153_p8 = pneg %p1152_p7 }
 0x422   : > { %p1159_p13 = por %p1158_p12, %p1157_p11 }
 0x424   : > { %p1160_p0 = pnand %p1159_p13, %p1153_p8 }
 0x426   : > { %1163 = shalt.err (!%p1160_p0)
}
 0x427   : > { %1056 = dma.vmem_to_hbm [thread:$0]  (%p1304_p5), %s1450_s29, 128, %s1448_s12, %s827_s18  }
 0x428 PF: > { %p1062_p1 = scmp.ge.s32.totalorder %s1198_s16, 2  ;;  %s852_s17 = sand.u32 1, %s1186_s13  }
 0x429   : > { %s853_s25 = scalar_lea.sflag [#allocation3], %s852_s17 }
 0x42a   : > { %p1059_p2 = pnand %p1062_p1, %p1308_p6 }
 0x42c   : > { %1181 = dma.done.wait (!%p1059_p2), %s853_s25, 128  }
 0x42d   : > { %1183 = vsyncadd (!%p1059_p2), %s853_s25, 4294967168  ;;  %p20_p3 = scmp.ge.s32.totalorder %s1291_s19, 4   ;;  %s1503_s13 = smov %s1190_s14 }
 0x42e   : > { %s1504_s14 = smov %s1194_s15  ;;  %s1505_s15 = smov %s1302_s22 }
 0x42f   : > { %s1506_s16 = smov %s1291_s19  ;;  %22 = sbr.rel (!%p20_p3) target bundleno = 3 (0x3), region = 101 }
 0x436   :  { %858 = vsyncpa [#allocation3], 1 }
 0x437   :  { %860 = vsyncpa [#allocation3 + $0x1], 1 }

</bundles_post_ra>
